<compile_context>
chip_gen: v5e
topology: v5e:2x2
jax: 0.10.0
libtpu: 0.0.40
codegen_flags: <defaults>
</compile_context>

<pallas_src>
import math
import functools

import jax
import jax.numpy as jnp
from jax.experimental import pallas as pl
from jax.experimental.pallas import tpu as pltpu


def so2_m_conv_kernel(x_ref, w_ref, o_ref):
    # x: [tn, 2*C_in]; w: [2*C_in, 2*och]; o: [tn, 2*och] = [out_r | out_i]
    o_ref[...] = jnp.dot(
        x_ref[...], w_ref[...], preferred_element_type=jnp.float32
    ).astype(o_ref.dtype)


def _round_up(x: int, m: int) -> int:
    return ((x + m - 1) // m) * m


def _pick_tile(n_rows: int, tn_max: int) -> int:
    # Multiple of 8 (f32 sublane), capped at tn_max; aim for ~8 grid steps so
    # dimension_semantics=("parallel",) can still shard across 2 TCs on v7x.
    tn = _round_up(max(1, (n_rows + 7) // 8), 8)
    return max(8, min(tn, tn_max))


@functools.partial(jax.jit, static_argnames=("m_output_channels", "tn_max"))
def so2_m_conv(x_m, weight, *, m_output_channels, tn_max=1024):
    """x_m: [N, 2, C_in]; weight: [2*och, C_in] (PyTorch Linear layout, already /sqrt(2))."""
    N, two, C_in = x_m.shape
    assert two == 2
    och = weight.shape[0] // 2
    k_in = 2 * C_in
    k_out = 2 * och

    # Fused block weight: [x0 | x1] @ [[Wr^T, Wi^T], [-Wi^T, Wr^T]] = [out_r | out_i]
    wr_t = weight[:och, :].T          # [C_in, och]
    wi_t = weight[och:, :].T          # [C_in, och]
    w_big = jnp.concatenate(
        [
            jnp.concatenate([wr_t, wi_t], axis=1),
            jnp.concatenate([-wi_t, wr_t], axis=1),
        ],
        axis=0,
    )                                  # [2*C_in, 2*och]

    # Contiguous LHS (free reshape, no strided middle-axis copies).
    x_flat = x_m.reshape(N, k_in)

    tn = _pick_tile(N, tn_max)
    n_pad = _round_up(N, tn)
    if n_pad != N:
        x_flat = jnp.pad(x_flat, ((0, n_pad - N), (0, 0)))

    # Raise the scoped-VMEM limit only if the double-buffered tiles need it
    # (relevant for very large tn on v5e's 16 MiB default).
    itemsize = jnp.dtype(x_flat.dtype).itemsize
    est_vmem = (2 * tn * k_in + 2 * tn * k_out + k_in * k_out) * itemsize
    cp_kwargs = dict(dimension_semantics=("parallel",))
    if est_vmem > 12 * 1024 * 1024:
        cp_kwargs["vmem_limit_bytes"] = min(2 * est_vmem, 64 * 1024 * 1024)

    out = pl.pallas_call(
        so2_m_conv_kernel,
        out_shape=jax.ShapeDtypeStruct((n_pad, k_out), x_m.dtype),
        grid_spec=pltpu.PrefetchScalarGridSpec(
            num_scalar_prefetch=0,
            grid=(n_pad // tn,),
            in_specs=[
                pl.BlockSpec((tn, k_in), lambda i: (i, 0)),
                pl.BlockSpec((k_in, k_out), lambda i: (0, 0)),
            ],
            out_specs=pl.BlockSpec((tn, k_out), lambda i: (i, 0)),
        ),
        compiler_params=pltpu.CompilerParams(**cp_kwargs),
    )(x_flat, w_big)

    out = out[:N]
    out_r = out[:, :och].reshape(N, -1, m_output_channels)
    out_i = out[:, och:].reshape(N, -1, m_output_channels)
    return out_r, out_i
    # TODO(synk): for bf16 deployments, cast x_m / w_big to bf16 in the wrapper
    # (keep f32 MXU accumulation); tn must then be a multiple of 16.


def so2_m_conv_reference(x_m, weight, m_output_channels):
    """Pure-JAX reference matching the PyTorch forward exactly."""
    N = x_m.shape[0]
    och = weight.shape[0] // 2
    y = jnp.einsum("nmc,oc->nmo", x_m, weight)            # fc, no bias
    x_r, x_i = y[:, :, :och], y[:, :, och:]
    x_r_0, x_r_1 = x_r[:, 0:1, :], x_r[:, 1:2, :]
    x_i_0, x_i_1 = x_i[:, 0:1, :], x_i[:, 1:2, :]
    x_m_r = x_r_0 - x_i_1
    x_m_i = x_r_1 + x_i_0
    return (x_m_r.reshape(N, -1, m_output_channels),
            x_m_i.reshape(N, -1, m_output_channels))


if __name__ == "__main__":
    # Module hyper-parameters (small, consistent with SO2_m_Conv.__init__)
    m = 2
    sphere_channels = 8
    m_output_channels = 8
    lmax = 7
    mmax = 4
    assert mmax >= m

    num_coefficients = lmax - m + 1                         # 6
    num_channels = num_coefficients * sphere_channels       # 48
    out_channels_half = m_output_channels * (num_channels // sphere_channels)  # 48

    N = 20  # number of edges / rows (deliberately NOT a multiple of the tile)

    key = jax.random.PRNGKey(0)
    kx, kw = jax.random.split(key)

    # Deterministic parameter init (shape of self.fc.weight), then the *= 1/sqrt(2)
    fan_in = num_channels
    bound = 1.0 / math.sqrt(fan_in)
    weight = jax.random.uniform(
        kw, (2 * out_channels_half, num_channels),
        minval=-bound, maxval=bound, dtype=jnp.float32,
    ) * (1.0 / math.sqrt(2.0))

    x_m = jax.random.normal(kx, (N, 2, num_channels), dtype=jnp.float32)

    out_r, out_i = so2_m_conv(x_m, weight, m_output_channels=m_output_channels)
    jax.block_until_ready((out_r, out_i))

    ref_r, ref_i = so2_m_conv_reference(x_m, weight, m_output_channels)
    assert out_r.shape == (N, num_coefficients, m_output_channels)
    assert out_i.shape == (N, num_coefficients, m_output_channels)
    assert jnp.allclose(out_r, ref_r, atol=1e-5, rtol=1e-5)
    assert jnp.allclose(out_i, ref_i, atol=1e-5, rtol=1e-5)

    print("KERNEL_OK")
</pallas_src>

<mosaic_0001>
module attributes {stable_mosaic.version = 11 : i64} {
  func.func @so2_m_conv_kernel(%arg0: i32, %arg1: memref<8x96xf32, #tpu.memory_space<vmem>>, %arg2: memref<96x96xf32, #tpu.memory_space<vmem>>, %arg3: memref<8x96xf32, #tpu.memory_space<vmem>>) attributes {dimension_semantics = [#tpu.dimension_semantics<parallel>], iteration_bounds = array<i64: 3>, scalar_prefetch = 0 : i64, scratch_operands = 0 : i64, tpu.core_type = #tpu.core_type<tc>, window_params = [{transform_indices = @transform_0, window_bounds = array<i64: 8, 96>}, {pipeline_mode = #tpu.pipeline_mode<synchronous>, transform_indices = @transform_1, window_bounds = array<i64: 96, 96>}, {transform_indices = @transform_2, window_bounds = array<i64: 8, 96>}]} {
    %c0 = arith.constant 0 : index
    %c0_0 = arith.constant 0 : index
    %0 = vector.load %arg1[%c0, %c0_0] : memref<8x96xf32, #tpu.memory_space<vmem>>, vector<8x96xf32>
    %c0_1 = arith.constant 0 : index
    %c0_2 = arith.constant 0 : index
    %1 = vector.load %arg2[%c0_1, %c0_2] : memref<96x96xf32, #tpu.memory_space<vmem>>, vector<96x96xf32>
    %cst = arith.constant dense<0.000000e+00> : vector<8x96xf32>
    %2 = tpu.matmul %0, %1, %cst {dimension_numbers = #tpu.dot_dimension_numbers<[1], [0], [0], [1], [0, 0, 1, 1], [], []>} : vector<8x96xf32>, vector<96x96xf32>, vector<8x96xf32> -> vector<8x96xf32>
    %c0_3 = arith.constant 0 : index
    %c0_4 = arith.constant 0 : index
    %3 = vector.load %arg3[%c0_3, %c0_4] : memref<8x96xf32, #tpu.memory_space<vmem>>, vector<8x96xf32>
    tpu.vector_store %arg3[%c0_3, %c0_4], %2 {strides = array<i32>} : memref<8x96xf32, #tpu.memory_space<vmem>>, vector<8x96xf32>,
    return
  }
  func.func @transform_0(%arg0: i32) -> (i32, i32) {
    %c0_i32 = arith.constant 0 : i32
    %c0_i32_0 = arith.constant 0 : i32
    return %arg0, %c0_i32 : i32, i32
  }
  func.func @transform_1(%arg0: i32) -> (i32, i32) {
    %c0_i32 = arith.constant 0 : i32
    %c0_i32_0 = arith.constant 0 : i32
    %c0_i32_1 = arith.constant 0 : i32
    return %c0_i32, %c0_i32_0 : i32, i32
  }
  func.func @transform_2(%arg0: i32) -> (i32, i32) {
    %c0_i32 = arith.constant 0 : i32
    %c0_i32_0 = arith.constant 0 : i32
    return %arg0, %c0_i32 : i32, i32
  }
}

</mosaic_0001>

<bundles_post_ra>
// kernel: so2_m_conv.1
= control target key start
LH: loop header
LB: loop body
LE: loop exit
PB: predicated region body
PF: predicated region fallthrough
CT: control target
= control target key end

     0   :  { %s271_s9 = smov 0   ;;  %s324_s0 = inlined_call_operand.vmem [shape: f32[24,96], index: 0, kind: input, shape index: {}]   ;;  %s325_s1 = inlined_call_operand.vmem [shape: f32[96,96], index: 1, kind: input, shape index: {}]   ;;  %s326_s2 = inlined_call_operand.vmem [shape: f32[24,96], index: 2, kind: output, shape index: {}]  }
   0x1 LB: > { %s230_s10 = sadd.s32 4294967295, %s254_s9   ;;  %p234_p0 = scmp.ge.s32.totalorder %s254_s9, 1  ;;  %s254_s9 = sphi %s271_s9, %s12_s9  }
   0x2   : > { %p111_p1 = scmp.lt.s32.totalorder %s254_s9, 4 }
   0x4   : > { %p112_p2 = pnand %p234_p0, %p111_p1 }
   0x5   : > { %p131_p3 = scmp.lt.s32.totalorder (!%p112_p2), %s230_s10, 2 }
   0x6   : > { %115 = sbr.rel (%p112_p2) target bundleno = 162 (0xa2), region = 28 }
   0xb   : > { %v151_v0 = vld [vmem:[%s325_s1 + $0x58] sm:$0xff]  ;;  %v150_v1 = vld [vmem:[%s325_s1 + $0x50] sm:$0xff]  ;;  %v149_v2 = vld [vmem:[%s325_s1 + $0x48] sm:$0xff]  ;;  %s328_s10 = smov (!%p131_p3, %s230_s10), 2  ;;  %vm152_vm0 = vcmask 785408  }
   0xc   : > { %160 = vmatpush.msra.mxu0 %v151_v0  ;;  %v148_v3 = vld [vmem:[%s325_s1 + $0x40] sm:$0xff]  ;;  %v147_v4 = vld [vmem:[%s325_s1 + $0x38] sm:$0xff]  ;;  %v146_v5 = vld [vmem:[%s325_s1 + $0x30] sm:$0xff]  ;;  %s235_s29 = sshll.u32 %s328_s10, 3 }
   0xd   : > { %v145_v6 = vld [vmem:[%s325_s1 + $0x28] sm:$0xff]  ;;  %v144_v7 = vld [vmem:[%s325_s1 + $0x20] sm:$0xff]  ;;  %v143_v8 = vld [vmem:[%s325_s1 + $0x18] sm:$0xff]  ;;  %s134_s8 = scalar_lea.vmem %s324_s0, %s235_s29  ;;  %s138_s14 = scalar_lea.vmem %s326_s2, %s235_s29 }
   0xe   : > { %161 = vmatpush.msra.mxu0 %v150_v1  ;;  %v142_v9 = vld [vmem:[%s325_s1 + $0x10] sm:$0xff]  ;;  %v141_v10 = vld [vmem:[%s325_s1 + $0x8] sm:$0xff]  ;;  %v140_v11 = vld [vmem:[%s325_s1] sm:$0xff] }
   0xf   : > { %v139_v12 = vld [vmem:[%s134_s8] sm:$0xff] }
  0x10   : > { %162 = vmatpush.msra.mxu0 %v149_v2 }
  0x12   : > { %163 = vmatpush.msra.mxu0 %v148_v3 }
  0x14   : > { %164 = vmatpush.msra.mxu0 %v147_v4 }
  0x16   : > { %165 = vmatpush.msra.mxu0 %v146_v5 }
  0x18   : > { %166 = vmatpush.msra.mxu0 %v145_v6 }
  0x1a   : > { %167 = vmatpush.msra.mxu0 %v144_v7 }
  0x1c   : > { %168 = vmatpush.msra.mxu0 %v143_v8 }
  0x1e   : > { %169 = vmatpush.msra.mxu0 %v142_v9 }
  0x20   : > { %170 = vmatpush.msra.mxu0 %v141_v10 }
  0x22   : > { %171 = vmatpush.msra.mxu0 %v140_v11 }
  0x23   : > { %237 = vmatmul.msk.f32.vlgmr.msra.gmra.mxu0 %vm152_vm0, %v139_v12 }
  0xa0   : > { %v173_v13 = vpop.f32.mrf.mxu0 }
  0xa1   : > { %176 = vst.msk [vmem:[%s138_s14] sm:$0xff] %vm152_vm0, %v173_v13 }
  0xa2 PF: > { %s12_s9 = sadd.s32 1, %s254_s9  }
  0xa3   : > { %p9_p4 = scmp.ge.s32.totalorder %s12_s9, 5  }
  0xa5   :  { %11 = sbr.rel (!%p9_p4) target bundleno = 1 (0x1), region = 58 }

</bundles_post_ra>
